<compile_context>
chip_gen: v7x
topology: tpu7x:2x2x1
jax: 0.10.0
libtpu: 0.0.40
codegen_flags: <defaults>
</compile_context>

<pallas_src>
import jax
import jax.numpy as jnp
import numpy as np
from jax.experimental import pallas as pl
from jax.experimental.pallas import tpu as pltpu


def _logistic_filter_kernel(slope_ref, pos_ref, w_ref, o_ref):
    # slope_ref: (1,) f32 in SMEM. pos_ref/w_ref/o_ref: (block_rows, n_tokens) VMEM tiles.
    slope = slope_ref[0]
    x = slope * pos_ref[...].astype(jnp.float32) + 1.0
    # sigmoid(x) * sigmoid(-x) == 0.25 * (1 - tanh(x/2)^2)  (single EUP op, no divide)
    t = jnp.tanh(0.5 * x)
    y = w_ref[...].astype(jnp.float32) * (0.25 * (1.0 - t * t))
    o_ref[...] = y.astype(o_ref.dtype)


def _round_up(x: int, m: int) -> int:
    return ((x + m - 1) // m) * m


def _choose_block_rows(n_pts: int, n_tokens: int, bytes_per_elem: int) -> int:
    """Row-block choice:
      * <= ~2 MiB per operand per block (already in the HBM-roofline regime),
      * rows multiple of 8 (sublane) unless using the full n_pts extent,
      * >= 2 blocks whenever n_pts > 8 (megacore sharding on v7x),
      * balanced blocks so the partial last block wastes <= 7 rows."""
    target_block_bytes = 2 * 1024 * 1024
    max_rows = max(8, (target_block_bytes // (bytes_per_elem * max(n_tokens, 1))) // 8 * 8)
    if n_pts > 8:
        # Keep at least two grid steps so "parallel" spans both TensorCores.
        max_rows = min(max_rows, _round_up(pl.cdiv(n_pts, 2), 8))
    if n_pts <= max_rows:
        return n_pts  # single full-extent block (exempt from 8-divisibility)
    n_blocks = pl.cdiv(n_pts, max_rows)
    return _round_up(pl.cdiv(n_pts, n_blocks), 8)


def logistic_filter(positions, weights, slope):
    """positions: (n_pts, n_tokens); weights: (n_pts, n_tokens, 1) or (n_pts, n_tokens).
    Returns (n_pts, n_tokens) in the promoted input dtype (matches PyTorch forward)."""
    n_pts, n_tokens = positions.shape
    if weights.ndim == 3:
        assert weights.shape == (n_pts, n_tokens, 1), weights.shape
        weights = weights.reshape(n_pts, n_tokens)  # squeeze(-1): metadata-only reshape
    else:
        assert weights.shape == (n_pts, n_tokens), weights.shape

    out_dtype = jnp.result_type(positions.dtype, weights.dtype)
    bytes_per_elem = max(positions.dtype.itemsize, weights.dtype.itemsize,
                         jnp.dtype(out_dtype).itemsize)
    block_rows = _choose_block_rows(n_pts, n_tokens, bytes_per_elem)
    grid = (pl.cdiv(n_pts, block_rows),)

    # slope as an SMEM scalar input: no retrace per value, jit/traced-slope safe.
    slope_arr = jnp.asarray(slope, jnp.float32).reshape(1)

    n_elems = n_pts * n_tokens
    cost = pl.CostEstimate(
        flops=7 * n_elems,
        transcendentals=n_elems,
        bytes_accessed=(positions.dtype.itemsize + weights.dtype.itemsize
                        + jnp.dtype(out_dtype).itemsize) * n_elems,
    )

    return pl.pallas_call(
        _logistic_filter_kernel,
        out_shape=jax.ShapeDtypeStruct((n_pts, n_tokens), out_dtype),
        grid_spec=pltpu.PrefetchScalarGridSpec(
            num_scalar_prefetch=0,
            grid=grid,
            in_specs=[
                pl.BlockSpec(memory_space=pltpu.MemorySpace.SMEM),       # slope (1,)
                pl.BlockSpec((block_rows, n_tokens), lambda i: (i, 0)),  # positions
                pl.BlockSpec((block_rows, n_tokens), lambda i: (i, 0)),  # weights
            ],
            out_specs=pl.BlockSpec((block_rows, n_tokens), lambda i: (i, 0)),
        ),
        compiler_params=pltpu.CompilerParams(
            dimension_semantics=("parallel",),
            vmem_limit_bytes=32 * 1024 * 1024,
        ),
        cost_estimate=cost,
    )(slope_arr, positions, weights)


def logistic_filter_ref(positions, weights, slope):
    if weights.ndim == 3:
        weights = weights.reshape(weights.shape[:-1])
    x = slope * positions + 1.0
    return weights * jax.nn.sigmoid(x) * jax.nn.sigmoid(-x)


if __name__ == "__main__":
    slope = 10.0
    n_pts, n_tokens = 16, 64

    key = jax.random.PRNGKey(0)
    kp, kw = jax.random.split(key)
    positions = jax.random.uniform(kp, (n_pts, n_tokens), jnp.float32,
                                   minval=-1.0, maxval=1.0)
    weights = jax.random.normal(kw, (n_pts, n_tokens, 1), jnp.float32)

    out = jax.block_until_ready(logistic_filter(positions, weights, slope))

    ref = logistic_filter_ref(positions, weights, slope)
    np.testing.assert_allclose(np.asarray(out), np.asarray(ref),
                               rtol=1e-5, atol=1e-6)
    print("KERNEL_OK")
</pallas_src>

<mosaic_0001>
module attributes {stable_mosaic.version = 11 : i64} {
  func.func @_logistic_filter_kernel(%arg0: i32, %arg1: memref<1xf32, #tpu.memory_space<smem>>, %arg2: memref<8x64xf32, #tpu.memory_space<vmem>>, %arg3: memref<8x64xf32, #tpu.memory_space<vmem>>, %arg4: memref<8x64xf32, #tpu.memory_space<vmem>>) attributes {dimension_semantics = [#tpu.dimension_semantics<parallel>], iteration_bounds = array<i64: 2>, scalar_prefetch = 0 : i64, scratch_operands = 0 : i64, tpu.core_type = #tpu.core_type<tc>, window_params = [{transform_indices = @transform_0, window_bounds = array<i64: 1>}, {transform_indices = @transform_1, window_bounds = array<i64: 8, 64>}, {transform_indices = @transform_2, window_bounds = array<i64: 8, 64>}, {transform_indices = @transform_3, window_bounds = array<i64: 8, 64>}]} {
    %c0 = arith.constant 0 : index
    %0 = memref.load %arg1[%c0] : memref<1xf32, #tpu.memory_space<smem>>
    %c0_0 = arith.constant 0 : index
    %c0_1 = arith.constant 0 : index
    %1 = vector.load %arg2[%c0_0, %c0_1] : memref<8x64xf32, #tpu.memory_space<vmem>>, vector<8x64xf32>
    %2 = vector.broadcast %0 : f32 to vector<8x64xf32>
    %3 = arith.mulf %2, %1 : vector<8x64xf32>
    %cst = arith.constant 1.000000e+00 : f32
    %4 = vector.broadcast %cst : f32 to vector<8x64xf32>
    %5 = arith.addf %3, %4 : vector<8x64xf32>
    %cst_2 = arith.constant 5.000000e-01 : f32
    %6 = vector.broadcast %cst_2 : f32 to vector<8x64xf32>
    %7 = arith.mulf %6, %5 : vector<8x64xf32>
    %8 = math.tanh %7 : vector<8x64xf32>
    %c0_3 = arith.constant 0 : index
    %c0_4 = arith.constant 0 : index
    %9 = vector.load %arg3[%c0_3, %c0_4] : memref<8x64xf32, #tpu.memory_space<vmem>>, vector<8x64xf32>
    %10 = arith.mulf %8, %8 : vector<8x64xf32>
    %cst_5 = arith.constant 1.000000e+00 : f32
    %11 = vector.broadcast %cst_5 : f32 to vector<8x64xf32>
    %12 = arith.subf %11, %10 : vector<8x64xf32>
    %cst_6 = arith.constant 2.500000e-01 : f32
    %13 = vector.broadcast %cst_6 : f32 to vector<8x64xf32>
    %14 = arith.mulf %13, %12 : vector<8x64xf32>
    %15 = arith.mulf %9, %14 : vector<8x64xf32>
    %c0_7 = arith.constant 0 : index
    %c0_8 = arith.constant 0 : index
    %16 = vector.load %arg4[%c0_7, %c0_8] : memref<8x64xf32, #tpu.memory_space<vmem>>, vector<8x64xf32>
    tpu.vector_store %arg4[%c0_7, %c0_8], %15 {strides = array<i32>} : memref<8x64xf32, #tpu.memory_space<vmem>>, vector<8x64xf32>,
    return
  }
  func.func @transform_0(%arg0: i32) -> i32 {
    %c0_i32 = arith.constant 0 : i32
    %c0_i32_0 = arith.constant 0 : i32
    return %c0_i32 : i32
  }
  func.func @transform_1(%arg0: i32) -> (i32, i32) {
    %c0_i32 = arith.constant 0 : i32
    %c0_i32_0 = arith.constant 0 : i32
    return %arg0, %c0_i32 : i32, i32
  }
  func.func @transform_2(%arg0: i32) -> (i32, i32) {
    %c0_i32 = arith.constant 0 : i32
    %c0_i32_0 = arith.constant 0 : i32
    return %arg0, %c0_i32 : i32, i32
  }
  func.func @transform_3(%arg0: i32) -> (i32, i32) {
    %c0_i32 = arith.constant 0 : i32
    %c0_i32_0 = arith.constant 0 : i32
    return %arg0, %c0_i32 : i32, i32
  }
}

</mosaic_0001>

<bundles_post_ra>
// kernel: tpu_custom_call.1
= control target key start
LH: loop header
LB: loop body
LE: loop exit
PB: predicated region body
PF: predicated region fallthrough
CT: control target
= control target key end

     0   :  { %s780_s0 = inlined_call_operand.<no memory space> [shape: f32[1], index: 0, kind: input, shape index: {}]   ;;  %s781_s1 = inlined_call_operand.hbm [shape: f32[16,64], index: 1, kind: input, shape index: {}]   ;;  %s782_s2 = inlined_call_operand.hbm [shape: f32[16,64], index: 2, kind: input, shape index: {}]   ;;  %s783_s3 = inlined_call_operand.hbm [shape: f32[16,64], index: 3, kind: output, shape index: {}]  }
   0x1   :  { %8 = sst [smem:[#allocation2]] %s780_s0 }
   0x2   :  { %9 = vsyncpa [#allocation4], 0 }
   0x3   :  { %11 = vsyncpa [#allocation4 + $0x1], 0 }
   0x4   :  { %12 = vsyncpa [#allocation7], 0 }
   0x5   :  { %14 = vsyncpa [#allocation7 + $0x1], 0 }
   0x6   :  { %15 = vsyncpa [#allocation5], 0 }
   0x7   :  { %17 = vsyncpa [#allocation5 + $0x1], 0  ;;  %s571_s14 = smov 0   ;;  %s573_s15 = smov 0  }
   0x8   :  { %s575_s16 = smov 0   ;;  %s577_s17 = smov 0  }
   0x9 LB: > { %s592_s0 = sadd.s32 4294967295, %s543_s17   ;;  %s345_s18 = sadd.s32 4294967294, %s543_s17   ;;  %s543_s17 = sphi %s577_s17, %s802_s17   ;;  %s539_s16 = sphi %s575_s16, %s801_s16   ;;  %s535_s15 = sphi %s573_s15, %s800_s15   ;;  %s531_s14 = sphi %s571_s14, %s799_s14  }
   0xa   : > { %s596_s19 = sadd.s32 1, %s543_s17   ;;  %s51_s20 = sadd.s32 1, %s539_s16 }
   0xb   : > { %s48_s21 = ssub.s32 %s543_s17, %s596_s19  ;;  %p58_p0 = scmp.ne.s32.totalorder %s539_s16, %s535_s15 }
   0xc   : > { %p49_p1 = scmp.eq.s32.totalorder %s48_s21, 0  ;;  %p59_p2 = scmp.eq.s32.totalorder %s543_s17, 0 }
   0xd   : > { %p64_p3 = scmp.ne.s32.totalorder %s535_s15, %s531_s14  ;;  %p65_p4 = scmp.eq.s32.totalorder %s592_s0, 0 }
   0xe   : > { %s608_s22 = scalar_select %p49_p1, %s539_s16, %s51_s20  }
   0xf   : > { %p610_p5 = por %p59_p2, %p58_p0  ;;  %p614_p6 = por %p65_p4, %p64_p3 }
  0x10   : > { %p114_p7 = scmp.eq.s32.totalorder %s592_s0, 1  ;;  %p120_p8 = scmp.eq.s32.totalorder %s345_s18, 1 }
  0x11   : > { %s787_s24 = scalar_select %p614_p6, 1, 0 }
  0x12   : > { %p377_p10 = scmp.lt.s32.totalorder %s543_s17, 2  ;;  %p621_p11 = por %p114_p7, %p58_p0 }
  0x13   : > { %p625_p12 = por %p120_p8, %p64_p3  ;;  %s630_s27 = sand.u32 1, %s539_s16  }
  0x14   : > { %s788_s25 = scalar_select %p621_p11, 1, 0 }
  0x15   : > { %s789_s26 = scalar_select %p625_p12, 1, 0 }
  0x16   : > { %s349_s28 = sshll.u32 %s543_s17, 7  ;;  %s348_s29 = sshll.u32 %s630_s27, 3 }
  0x17   : > { %s639_s5 = scalar_lea.hbm %s781_s1, %s349_s28  ;;  %s147_s6 = scalar_lea.vmem [#allocation3], %s348_s29 }
  0x18   : > { %s154_s7 = sshll.u32 %s147_s6, 4  ;;  %p645_p13 = pnand %p377_p10, %p610_p5  ;;  %s649_s7 = int_to_ptr.vmem [resolvable:$true] %s154_s7 }
  0x19   : > { %s144_s9 = scalar_lea.sflag [#allocation4], %s630_s27  ;;  %s413_s10 = scalar_lea.hbm %s639_s5, 128 }
  0x1a   : > { %p414_p2 = scmp.ne.s32.totalorder %s639_s5, %s413_s10  ;;  %p415_p3 = pneg %p645_p13 }
  0x1b   : > { %s418_s13 = scalar_lea.hbm %s781_s1, 256  ;;  %p419_p5 = scmp.lt.u32.totalorder %s639_s5, %s781_s1 }
  0x1c   : > { %p416_p4 = pnand %p415_p3, %p414_p2  ;;  %p420_p8 = scmp.lt.u32.totalorder %s418_s13, %s413_s10 }
  0x1d   : > { %p422_p9 = scmp.lt.u32.totalorder %s413_s10, %s639_s5 }
  0x1e   : > { %p417_p7 = pneg %p416_p4  ;;  %p421_p10 = por %p420_p8, %p419_p5 }
  0x20   : > { %p423_p0 = por %p422_p9, %p421_p10 }
  0x22   : > { %p424_p1 = pnand %p423_p0, %p417_p7 }
  0x24   : > { %427 = shalt.err (!%p424_p1)
}
  0x25   : > { %s428_s21 = scalar_lea.vmem %s649_s7, 128  ;;  %s545_s23 = smov [#allocation3]  }
  0x26   : > { %p429_p2 = scmp.ne.s32.totalorder %s649_s7, %s428_s21  ;;  %s433_s30 = sshll.u32 %s545_s23, 4  ;;  %s434_s30 = int_to_ptr.vmem [resolvable:$false] %s433_s30 }
  0x27   : > { %s435_s4 = scalar_lea.vmem %s434_s30, 256  ;;  %p436_p11 = scmp.lt.s32.totalorder %s649_s7, %s434_s30 }
  0x28   : > { %p431_p4 = pnand %p429_p2, %p415_p3  ;;  %p437_p5 = scmp.lt.s32.totalorder %s435_s4, %s428_s21 }
  0x2a   : > { %p432_p12 = pneg %p431_p4  ;;  %p438_p8 = por %p437_p5, %p436_p11 }
  0x2c   : > { %p439_p9 = pnand %p438_p8, %p432_p12 }
  0x2e   : > { %442 = shalt.err (!%p439_p9)
}
  0x2f   : > { %369 = dma.hbm_to_vmem [thread:$0]  (!%p645_p13), %s639_s5, 128, %s649_s7, %s144_s9  }
  0x30   : > { %p791_p0 = scmp.lt.s32.totalorder %s543_s17, 3  ;;  %p792_p1 = scmp.ge.s32.totalorder %s543_s17, 1 }
  0x31   : > { %s692_s12 = scalar_lea.hbm %s782_s2, %s349_s28  ;;  %s165_s13 = scalar_lea.vmem [#allocation6], %s348_s29 }
  0x32   : > { %p683_p7 = pnand %p792_p1, %p791_p0  ;;  %s172_s18 = sshll.u32 %s165_s13, 4  ;;  %s173_s18 = int_to_ptr.vmem [resolvable:$true] %s172_s18 }
  0x33   : > { %s162_s5 = scalar_lea.sflag [#allocation7], %s630_s27  ;;  %s443_s7 = scalar_lea.hbm %s692_s12, 128 }
  0x34   : > { %s793_s6 = scalar_select %p683_p7, 1, 0 }
  0x35   : > { %p444_p11 = scmp.ne.s32.totalorder %s692_s12, %s443_s7  ;;  %s448_s28 = scalar_lea.hbm %s782_s2, 256 }
  0x36   : > { %p449_p2 = scmp.lt.u32.totalorder %s692_s12, %s782_s2  ;;  %p450_p4 = scmp.lt.u32.totalorder %s448_s28, %s443_s7 }
  0x37   : > { %p446_p12 = pnand %p444_p11, %p415_p3  ;;  %p452_p8 = scmp.lt.u32.totalorder %s443_s7, %s692_s12 }
  0x38   : > { %p451_p5 = por %p450_p4, %p449_p2 }
  0x39   : > { %p447_p10 = pneg %p446_p12 }
  0x3a   : > { %p453_p9 = por %p452_p8, %p451_p5 }
  0x3c   : > { %p454_p0 = pnand %p453_p9, %p447_p10 }
  0x3e   : > { %457 = shalt.err (!%p454_p0)
}
  0x3f   : > { %s458_s27 = scalar_lea.vmem %s173_s18, 128  ;;  %s546_s29 = smov [#allocation6]  }
  0x40   : > { %p459_p1 = scmp.ne.s32.totalorder %s173_s18, %s458_s27  ;;  %s463_s30 = sshll.u32 %s546_s29, 4  ;;  %s464_s30 = int_to_ptr.vmem [resolvable:$false] %s463_s30 }
  0x41   : > { %s465_s4 = scalar_lea.vmem %s464_s30, 256  ;;  %p466_p6 = scmp.lt.s32.totalorder %s173_s18, %s464_s30 }
  0x42   : > { %p461_p11 = pnand %p459_p1, %p415_p3  ;;  %p467_p7 = scmp.lt.s32.totalorder %s465_s4, %s458_s27 }
  0x44   : > { %p462_p12 = pneg %p461_p11  ;;  %p468_p2 = por %p467_p7, %p466_p6 }
  0x46   : > { %p469_p4 = pnand %p468_p2, %p462_p12 }
  0x48   : > { %472 = shalt.err (!%p469_p4)
}
  0x49   : > { %372 = dma.hbm_to_vmem [thread:$0]  (!%p645_p13), %s692_s12, 128, %s173_s18, %s162_s5  }
  0x4a   : > { %p794_p10 = scmp.ne.s32.totalorder %s793_s6, 0 }
  0x4b   : > { %s719_s10 = sand.u32 (!%p794_p10), 1, %s535_s15   ;;  %p795_p3 = scmp.ne.s32.totalorder (!%p794_p10), %s787_s24, 0 }
  0x4c   : > { %181 = sbr.rel (%p794_p10) target bundleno = 132 (0x84), region = 32  ;;  %s353_s11 = sshll.u32 (!%p794_p10), %s719_s10, 3 }
  0x4d   : > { %s184_s13 = scalar_lea.sflag (!%p794_p10), [#allocation4], %s719_s10  ;;  %s187_s7 = scalar_lea.vmem (!%p794_p10), [#allocation3], %s353_s11 }
  0x53   : > { %518 = dma.done.wait (%p795_p3), %s184_s13, 128  }
  0x54   : > { %520 = vsyncadd (%p795_p3), %s184_s13, 4294967168  ;;  %s193_s8 = scalar_lea.sflag [#allocation7], %s719_s10  ;;  %s196_s12 = scalar_lea.vmem [#allocation6], %s353_s11 }
  0x55   : > { %522 = dma.done.wait (%p795_p3), %s193_s8, 128  }
  0x56   : > { %524 = vsyncadd (%p795_p3), %s193_s8, 4294967168  ;;  %s224_s6 = sld [smem:[#allocation2]]  ;;  %v225_v0 = vld [vmem:[%s187_s7] sm:$0xff]  ;;  %v231_v8 = vld [vmem:[%s196_s12] sm:$0xff]  ;;  %s223_s18 = scalar_lea.vmem [#allocation8], %s353_s11  ;;  %vm236_vm0 = vcmask 523264  }
  0x57   : > { %s252_s5 = sshll.u32 %s223_s18, 4  ;;  %s357_s9 = sshll.u32 %s592_s0, 7  ;;  %s733_s5 = int_to_ptr.vmem [resolvable:$true] %s252_s5 }
  0x58   : > { %s738_s28 = scalar_lea.hbm %s783_s3, %s357_s9  ;;  %s239_s21 = scalar_lea.sflag [#allocation5], %s719_s10 }
  0x59   : > { %s473_s23 = scalar_lea.vmem %s733_s5, 128  ;;  %p796_p13 = scmp.ne.s32.totalorder %s788_s25, 0 }
  0x5a   : > { %p474_p6 = scmp.ne.s32.totalorder %s733_s5, %s473_s23  ;;  %s547_s0 = smov [#allocation8]  }
  0x5b   : > { %s477_s27 = sshll.u32 %s547_s0, 4  ;;  %s478_s27 = int_to_ptr.vmem [resolvable:$false] %s477_s27 }
  0x5c   : > { %v226_v1 = vstv %s224_s6  ;;  %p475_p7 = pnand %p474_p6, %p796_p13  ;;  %s479_s29 = scalar_lea.vmem %s478_s27, 256 }
  0x5d   : > { %v227_v2 = vmul.f32 %v226_v1, %v225_v0  ;;  %p480_p8 = scmp.lt.s32.totalorder %s733_s5, %s478_s27  ;;  %p481_p9 = scmp.lt.s32.totalorder %s479_s29, %s473_s23 }
  0x5e   : > { %p476_p5 = pneg %p475_p7 }
  0x5f   : > { %v228_v3 = vadd.f32 1.0, %v227_v2  ;;  %p482_p0 = por %p481_p9, %p480_p8 }
  0x61   : > { %v229_v4 = vmul.f32 0.5, %v228_v3  ;;  %p483_p1 = pnand %p482_p0, %p476_p5 }
  0x63   : > { %411 = vtanh.f32 %v229_v4 }
  0x6d   : > { %v412_v5 = vpop.eup %411 }
  0x6e   : > { %v232_v6 = vmul.f32 %v412_v5, %v412_v5 }
  0x70   : > { %v233_v7 = vsub.f32 1.0, %v232_v6 }
  0x72   : > { %v234_v9 = vmul.f32 0.25, %v233_v7 }
  0x74   : > { %v235_v10 = vmul.f32 %v234_v9, %v231_v8 }
  0x76   : > { %237 = vst.msk [vmem:[%s223_s18] sm:$0xff] %vm236_vm0, %v235_v10 }
  0x77   : > { %486 = shalt.err (!%p483_p1)
}
  0x78   : > { %s487_s30 = scalar_lea.hbm %s738_s28, 128  ;;  %s491_s11 = scalar_lea.hbm %s783_s3, 256 }
  0x79   : > { %p488_p11 = scmp.ne.s32.totalorder %s738_s28, %s487_s30  ;;  %p492_p4 = scmp.lt.u32.totalorder %s738_s28, %s783_s3 }
  0x7a   : > { %p493_p10 = scmp.lt.u32.totalorder %s491_s11, %s487_s30  ;;  %p495_p6 = scmp.lt.u32.totalorder %s487_s30, %s738_s28 }
  0x7b   : > { %p489_p12 = pnand %p488_p11, %p796_p13 }
  0x7c   : > { %p494_p3 = por %p493_p10, %p492_p4 }
  0x7d   : > { %p490_p2 = pneg %p489_p12 }
  0x7e   : > { %p496_p7 = por %p495_p6, %p494_p3 }
  0x80   : > { %p497_p5 = pnand %p496_p7, %p490_p2 }
  0x82   : > { %500 = shalt.err (!%p497_p5)
}
  0x83   : > { %364 = dma.vmem_to_hbm [thread:$0]  (%p796_p13), %s733_s5, 128, %s738_s28, %s239_s21  }
  0x84 PF: > { %s264_s8 = sand.u32 1, %s531_s14   ;;  %p797_p8 = scmp.ne.s32.totalorder %s789_s26, 0 }
  0x85   : > { %p798_p9 = scmp.ge.s32.totalorder %s543_s17, 2  ;;  %s265_s12 = scalar_lea.sflag [#allocation5], %s264_s8 }
  0x87   : > { %p374_p0 = pnand %p798_p9, %p797_p8 }
  0x89   : > { %526 = dma.done.wait (!%p374_p0), %s265_s12, 128  }
  0x8a   : > { %528 = vsyncadd (!%p374_p0), %s265_s12, 4294967168  ;;  %p20_p1 = scmp.ge.s32.totalorder %s596_s19, 4   ;;  %s799_s14 = smov %s535_s15 }
  0x8b   : > { %s800_s15 = smov %s539_s16  ;;  %s801_s16 = smov %s608_s22 }
  0x8c   : > { %s802_s17 = smov %s596_s19  ;;  %22 = sbr.rel (!%p20_p1) target bundleno = 9 (0x9), region = 90 }
  0x93   :  { %270 = vsyncpa [#allocation4], 1 }
  0x94   :  { %272 = vsyncpa [#allocation4 + $0x1], 1 }
  0x95   :  { %273 = vsyncpa [#allocation7], 1 }
  0x96   :  { %275 = vsyncpa [#allocation7 + $0x1], 1 }
  0x97   :  { %276 = vsyncpa [#allocation5], 1 }
  0x98   :  { %278 = vsyncpa [#allocation5 + $0x1], 1 }

</bundles_post_ra>
